<compile_context>
chip_gen: v6e
topology: v6e:2x2x1
jax: 0.10.0
libtpu: 0.0.40
codegen_flags: <defaults>
</compile_context>

<pallas_src>
import functools

import jax
import jax.numpy as jnp
from jax import lax
from jax.experimental import pallas as pl
from jax.experimental.pallas import tpu as pltpu


# ----------------------------------------------------------------------------
# Pallas kernel: grid = (classes, num_k); one step = one class block of
# `group` query rows against one chunk of `k_tile` key columns.
# ----------------------------------------------------------------------------
def _pnp_kernel(xc_ref, xk_ref, out_ref, anch_ref, rk_ref, *,
                b, alpha, anneal, variant, batch_size, group, k_tile,
                scale, cube_dtype):
    # xc_ref : (1, group, dim)   rows of the current class          (VMEM)
    # xk_ref : (k_tile, dim)     current chunk of key/value columns (VMEM)
    # out_ref: (1, 8, 128) f32   per-class partial loss (broadcast) (VMEM)
    # anch_ref: (group, group)   pre-scaled class-diagonal sims     (VMEM scratch)
    # rk_ref : (group, group)    running sum of masked tanh terms   (VMEM scratch)
    c = pl.program_id(0)
    k = pl.program_id(1)
    nk = pl.num_programs(1)
    half_inv_t = 0.5 / anneal                      # tanh form: sigmoid(z)=.5+.5*tanh(z/2)
    dims = (((1,), (1,)), ((), ()))                # contract embedding dim of both operands

    xc = xc_ref[0]                                 # (group, dim)

    @pl.when(k == 0)
    def _init():
        # anch[il, g] = <x_c[il], x_c[g]> * 0.5/anneal  -- once per class.
        anch_ref[...] = lax.dot_general(
            xc, xc, dims, preferred_element_type=jnp.float32) * half_inv_t
        rk_ref[...] = jnp.zeros_like(rk_ref)

    # sim[il, kk] = <x_c[il], x[k0+kk]> * 0.5/anneal           (group, k_tile)
    sim = lax.dot_general(
        xc, xk_ref[...], dims, preferred_element_type=jnp.float32) * half_inv_t

    # diff[il, g, kk] = (sim[i, k] - sim[i, j]) * 0.5/anneal,  j = c*group + g
    diff = sim[:, None, :] - anch_ref[...][:, :, None]         # (group, group, k_tile) f32
    if jnp.dtype(cube_dtype) != jnp.dtype(jnp.float32):
        diff = diff.astype(cube_dtype)                         # bf16 EUP path (v6e/v7x)
    t = jnp.tanh(diff)                                         # single EUP push per vreg

    # Negatives mask over the global column index: zero columns inside class c
    # (this also zeroes the k == i diagonal, matching torch's mask).
    kglob = lax.broadcasted_iota(jnp.int32, (1, 1, k_tile), 2) + k * k_tile
    lo = c * group
    in_class = (kglob >= lo) & (kglob < lo + group)
    t = jnp.where(in_class, 0.0, t)

    rk_ref[...] += jnp.sum(t, axis=-1, dtype=jnp.float32)      # (group, group)

    @pl.when(k == nk - 1)
    def _finalize():
        # Undo the tanh re-parameterization: rk = sum_neg sigmoid(diff/anneal)
        rk = 0.5 * rk_ref[...] + (0.5 * (batch_size - group))

        # Variant transform (static python branch, baked into the kernel).
        if variant == 'PNP-D_s':
            rk = jnp.log(1.0 + rk)
        elif variant == 'PNP-D_q':
            rk = jnp.exp(-alpha * jnp.log(1.0 + rk))           # == (1 + rk) ** -alpha
        elif variant == 'PNP-I_u':
            rk = (1.0 + rk) * jnp.log(1.0 + rk)
        elif variant == 'PNP-I_b':
            rk = (1.0 / (b * b)) * (b * rk - jnp.log(1.0 + b * rk))
        elif variant == 'PNP-O':
            pass
        else:
            raise ValueError('variantation <{}> not available!'.format(variant))

        # Per-class partial loss with /group /batch_size fused into one scale.
        partial = jnp.sum(rk) * scale
        out_ref[...] = jnp.full(out_ref.shape, partial, dtype=out_ref.dtype)


# ----------------------------------------------------------------------------
# Wrapper
# ----------------------------------------------------------------------------
def _pick_k_tile(bs, group):
    """Largest k chunk that keeps the (group, group, k_tile) cube temps ~bounded."""
    budget = 12 * 2 ** 20                      # target bytes for cube temporaries
    max_k = budget // max(1, 4 * group * group * 4)
    max_k = max(128, min(2048, max_k))
    if bs <= max_k:
        return bs
    best8, best128 = 0, 0
    for t in range(8, max_k + 1, 8):           # keep sublane-legal chunk sizes
        if bs % t == 0:
            best8 = t
            if t % 128 == 0:
                best128 = t                    # prefer lane-aligned chunks
    if best128:
        return best128
    if best8:
        return best8
    return bs                                  # fall back to a single full chunk


def pnp_loss_pallas(batch, *, b, alpha, anneal, variant, classes,
                    k_tile=None, cube_dtype=jnp.float32):
    bs, dim = batch.shape
    if bs % classes != 0:
        raise ValueError("batch size must be divisible by classes")
    group = bs // classes

    if k_tile is None:
        k_tile = _pick_k_tile(bs, group)
    if bs % k_tile != 0:
        raise ValueError("k_tile must divide batch size")
    num_k = bs // k_tile

    # One grid step along axis 0 maps to one class block of query rows.
    xr = batch.reshape(classes, group, dim)

    kernel = functools.partial(
        _pnp_kernel, b=float(b), alpha=float(alpha), anneal=float(anneal),
        variant=variant, batch_size=bs, group=group, k_tile=k_tile,
        scale=1.0 / (group * bs), cube_dtype=cube_dtype)

    itemsize = jnp.dtype(batch.dtype).itemsize
    cube_bytes = group * group * k_tile * 4
    step_bytes = (2 * 2 * (group + k_tile) * dim * itemsize    # double-buffered inputs
                  + 5 * cube_bytes                             # cube temporaries
                  + group * k_tile * 4                         # sim chunk
                  + 2 * group * group * 4                      # scratches
                  + 2 * 8 * 128 * 4)                           # output block
    # k-tiling bounds this independent of bs; stay well under v7x's 64 MiB.
    vmem_limit = int(min(48 * 2 ** 20, max(16 * 2 ** 20, 2 * step_bytes)))

    cost = pl.CostEstimate(
        flops=2 * bs * dim * (bs + group) + 5 * group * bs * bs,
        transcendentals=group * bs * bs,
        bytes_accessed=(classes + 1) * bs * dim * itemsize + classes * 8 * 128 * 4)

    out = pl.pallas_call(
        kernel,
        out_shape=jax.ShapeDtypeStruct((classes, 8, 128), jnp.float32),
        grid=(classes, num_k),
        in_specs=[
            pl.BlockSpec((1, group, dim), lambda c, k: (c, 0, 0)),  # class rows
            pl.BlockSpec((k_tile, dim), lambda c, k: (k, 0)),       # key-column chunk
        ],
        # Per-class partial in a layout-legal (1, 8, 128) tile; summed in JAX.
        out_specs=pl.BlockSpec((1, 8, 128), lambda c, k: (c, 0, 0)),
        scratch_shapes=[pltpu.VMEM((group, group), jnp.float32),    # anchor sims
                        pltpu.VMEM((group, group), jnp.float32)],   # rk accumulator
        compiler_params=pltpu.CompilerParams(
            # class axis is independent (per-class outputs) -> parallel (v7x 2 TCs);
            # the k reduction axis carries the rk accumulator -> arbitrary, last.
            dimension_semantics=("parallel", "arbitrary"),
            vmem_limit_bytes=vmem_limit),
        cost_estimate=cost,
    )(xr, batch)

    loss = jnp.sum(out[:, 0, 0]).reshape(1)
    if variant == 'PNP-D_q':
        loss = 1.0 - loss
    return loss  # shape (1,), matching the torch.zeros(1)-style return


# ----------------------------------------------------------------------------
# Pure-JAX reference (exact mirror of the PyTorch forward, full O(bs^3) cube)
# ----------------------------------------------------------------------------
def pnp_loss_ref(batch, *, b, alpha, anneal, variant, classes):
    bs = batch.shape[0]
    group = bs // classes
    x = batch.astype(jnp.float32)
    cls = jnp.arange(bs) // group
    same = (cls[:, None] == cls[None, :]).astype(jnp.float32)
    mask = 1.0 - same      # == torch: (1 - eye) with class blocks zeroed

    sim = x @ x.T
    diff = sim[:, None, :] - sim[:, :, None]
    expo = jnp.clip(-diff / anneal, -50.0, 50.0)
    sg = (1.0 / (1.0 + jnp.exp(expo))) * mask[None, :, :]
    rk = jnp.sum(sg, axis=-1)

    if variant == 'PNP-D_s':
        rk = jnp.log(1.0 + rk)
    elif variant == 'PNP-D_q':
        rk = 1.0 / (1.0 + rk) ** alpha
    elif variant == 'PNP-I_u':
        rk = (1.0 + rk) * jnp.log(1.0 + rk)
    elif variant == 'PNP-I_b':
        rk = 1.0 / b ** 2 * (b * rk - jnp.log(1.0 + b * rk))
    elif variant == 'PNP-O':
        pass
    else:
        raise ValueError('bad variant')

    loss = jnp.reshape(jnp.sum(rk * same) / group / bs, (1,))
    return 1.0 - loss if variant == 'PNP-D_q' else loss


# ----------------------------------------------------------------------------
if __name__ == "__main__":
    # Small, module-consistent shapes: 16 embeddings of dim 32, 2 classes
    # (group = 8 samples per class).
    bs, dim, classes = 16, 32, 2
    b, alpha, anneal = 2.0, 4.0, 0.05

    key = jax.random.PRNGKey(0)
    batch = jax.random.normal(key, (bs, dim), dtype=jnp.float32)
    # L2-normalize rows (typical embedding input for this loss)
    batch = batch / jnp.linalg.norm(batch, axis=-1, keepdims=True)

    all_ok = True
    for variant in ('PNP-O', 'PNP-D_s', 'PNP-D_q', 'PNP-I_u', 'PNP-I_b'):
        ref = pnp_loss_ref(batch, b=b, alpha=alpha, anneal=anneal,
                           variant=variant, classes=classes)
        # kt=None -> single k chunk; kt=8 -> exercises the k-accumulation path.
        for kt in (None, 8):
            out = jax.block_until_ready(
                pnp_loss_pallas(batch, b=b, alpha=alpha, anneal=anneal,
                                variant=variant, classes=classes, k_tile=kt))
            ok = bool(jnp.allclose(out, ref, rtol=1e-4, atol=1e-5))
            all_ok = all_ok and ok

    print("KERNEL_OK" if all_ok else "MISMATCH")
</pallas_src>

<mosaic_0001>
module attributes {stable_mosaic.version = 11 : i64} {
  func.func @_pnp_kernel(%arg0: i32, %arg1: i32, %arg2: memref<1x8x32xf32, #tpu.memory_space<vmem>>, %arg3: memref<16x32xf32, #tpu.memory_space<vmem>>, %arg4: memref<1x8x128xf32, #tpu.memory_space<vmem>>, %arg5: memref<8x8xf32, #tpu.memory_space<vmem>>, %arg6: memref<8x8xf32, #tpu.memory_space<vmem>>) attributes {dimension_semantics = [#tpu.dimension_semantics<parallel>, #tpu.dimension_semantics<arbitrary>], iteration_bounds = array<i64: 2, 1>, scalar_prefetch = 0 : i64, scratch_operands = 2 : i64, tpu.core_type = #tpu.core_type<tc>, window_params = [{transform_indices = @transform_0, window_bounds = array<i64: 1, 8, 32>}, {transform_indices = @transform_1, window_bounds = array<i64: 16, 32>}, {transform_indices = @transform_2, window_bounds = array<i64: 1, 8, 128>}]} {
    %c0 = arith.constant 0 : index
    %c0_0 = arith.constant 0 : index
    %c0_1 = arith.constant 0 : index
    %0 = vector.load %arg2[%c0, %c0_0, %c0_1] : memref<1x8x32xf32, #tpu.memory_space<vmem>>, vector<1x8x32xf32>
    %1 = vector.shape_cast %0 : vector<1x8x32xf32> to vector<8x32xf32>
    %c0_i32 = arith.constant 0 : i32
    %2 = arith.cmpi eq, %arg1, %c0_i32 : i32
    %3 = arith.extui %2 : i1 to i32
    %c0_i32_2 = arith.constant 0 : i32
    %4 = arith.cmpi ne, %3, %c0_i32_2 : i32
    scf.if %4 {
      %cst_17 = arith.constant dense<0.000000e+00> : vector<8x8xf32>
      %38 = tpu.matmul %1, %1, %cst_17 {dimension_numbers = #tpu.dot_dimension_numbers<[1], [1], [0], [0], [0, 0, 1, 0], [], []>} : vector<8x32xf32>, vector<8x32xf32>, vector<8x8xf32> -> vector<8x8xf32>
      %cst_18 = arith.constant 1.000000e+01 : f32
      %39 = vector.broadcast %cst_18 : f32 to vector<8x8xf32>
      %40 = arith.mulf %38, %39 : vector<8x8xf32>
      %c0_19 = arith.constant 0 : index
      %c0_20 = arith.constant 0 : index
      %41 = vector.load %arg5[%c0_19, %c0_20] : memref<8x8xf32, #tpu.memory_space<vmem>>, vector<8x8xf32>
      tpu.vector_store %arg5[%c0_19, %c0_20], %40 {strides = array<i32>} : memref<8x8xf32, #tpu.memory_space<vmem>>, vector<8x8xf32>,
      %cst_21 = arith.constant 0.000000e+00 : f32
      %42 = vector.broadcast %cst_21 : f32 to vector<8x8xf32>
      %c0_22 = arith.constant 0 : index
      %c0_23 = arith.constant 0 : index
      %43 = vector.load %arg6[%c0_22, %c0_23] : memref<8x8xf32, #tpu.memory_space<vmem>>, vector<8x8xf32>
      tpu.vector_store %arg6[%c0_22, %c0_23], %42 {strides = array<i32>} : memref<8x8xf32, #tpu.memory_space<vmem>>, vector<8x8xf32>,
    } else {
    }
    %c0_3 = arith.constant 0 : index
    %c0_4 = arith.constant 0 : index
    %5 = vector.load %arg3[%c0_3, %c0_4] : memref<16x32xf32, #tpu.memory_space<vmem>>, vector<16x32xf32>
    %cst = arith.constant dense<0.000000e+00> : vector<8x16xf32>
    %6 = tpu.matmul %1, %5, %cst {dimension_numbers = #tpu.dot_dimension_numbers<[1], [1], [0], [0], [0, 0, 1, 0], [], []>} : vector<8x32xf32>, vector<16x32xf32>, vector<8x16xf32> -> vector<8x16xf32>
    %cst_5 = arith.constant 1.000000e+01 : f32
    %7 = vector.broadcast %cst_5 : f32 to vector<8x16xf32>
    %8 = arith.mulf %6, %7 : vector<8x16xf32>
    %9 = vector.shape_cast %8 : vector<8x16xf32> to vector<8x1x16xf32>
    %c0_6 = arith.constant 0 : index
    %c0_7 = arith.constant 0 : index
    %10 = vector.load %arg5[%c0_6, %c0_7] : memref<8x8xf32, #tpu.memory_space<vmem>>, vector<8x8xf32>
    %11 = vector.shape_cast %10 : vector<8x8xf32> to vector<8x8x1xf32>
    %12 = vector.broadcast %9 : vector<8x1x16xf32> to vector<8x8x16xf32>
    %13 = vector.broadcast %11 : vector<8x8x1xf32> to vector<8x8x16xf32>
    %14 = arith.subf %12, %13 : vector<8x8x16xf32>
    %15 = math.tanh %14 : vector<8x8x16xf32>
    %16 = tpu.iota {dimensions = array<i32: 2>} : vector<1x1x16xi32>
    %c16_i32 = arith.constant 16 : i32
    %17 = arith.muli %arg1, %c16_i32 : i32
    %18 = vector.broadcast %17 : i32 to vector<1x1x16xi32>
    %19 = arith.addi %16, %18 : vector<1x1x16xi32>
    %c8_i32 = arith.constant 8 : i32
    %20 = arith.muli %arg0, %c8_i32 : i32
    %21 = vector.broadcast %20 : i32 to vector<1x1x16xi32>
    %22 = arith.cmpi sge, %19, %21 : vector<1x1x16xi32>
    %c8_i32_8 = arith.constant 8 : i32
    %23 = arith.addi %20, %c8_i32_8 : i32
    %24 = vector.broadcast %23 : i32 to vector<1x1x16xi32>
    %25 = arith.cmpi slt, %19, %24 : vector<1x1x16xi32>
    %26 = arith.andi %22, %25 : vector<1x1x16xi1>
    %cst_9 = arith.constant 0.000000e+00 : f32
    %27 = vector.shape_cast %26 : vector<1x1x16xi1> to vector<1x1x16xi1>
    %28 = vector.broadcast %27 : vector<1x1x16xi1> to vector<8x8x16xi1>
    %29 = vector.broadcast %cst_9 : f32 to vector<8x8x16xf32>
    %30 = arith.select %28, %29, %15 : vector<8x8x16xi1>, vector<8x8x16xf32>
    %c0_10 = arith.constant 0 : index
    %c0_11 = arith.constant 0 : index
    %31 = vector.load %arg6[%c0_10, %c0_11] : memref<8x8xf32, #tpu.memory_space<vmem>>, vector<8x8xf32>
    %cst_12 = arith.constant dense<0.000000e+00> : vector<8x8xf32>
    %32 = vector.multi_reduction <add>, %30, %cst_12 [2] : vector<8x8x16xf32> to vector<8x8xf32>
    %33 = arith.addf %31, %32 : vector<8x8xf32>
    %c0_13 = arith.constant 0 : index
    %c0_14 = arith.constant 0 : index
    %34 = vector.load %arg6[%c0_13, %c0_14] : memref<8x8xf32, #tpu.memory_space<vmem>>, vector<8x8xf32>
    tpu.vector_store %arg6[%c0_13, %c0_14], %33 {strides = array<i32>} : memref<8x8xf32, #tpu.memory_space<vmem>>, vector<8x8xf32>,
    %c0_i32_15 = arith.constant 0 : i32
    %35 = arith.cmpi eq, %arg1, %c0_i32_15 : i32
    %36 = arith.extui %35 : i1 to i32
    %c0_i32_16 = arith.constant 0 : i32
    %37 = arith.cmpi ne, %36, %c0_i32_16 : i32
    scf.if %37 {
      %c0_17 = arith.constant 0 : index
      %c0_18 = arith.constant 0 : index
      %38 = vector.load %arg6[%c0_17, %c0_18] : memref<8x8xf32, #tpu.memory_space<vmem>>, vector<8x8xf32>
      %cst_19 = arith.constant 5.000000e-01 : f32
      %39 = vector.broadcast %cst_19 : f32 to vector<8x8xf32>
      %40 = arith.mulf %39, %38 : vector<8x8xf32>
      %cst_20 = arith.constant 4.000000e+00 : f32
      %41 = vector.broadcast %cst_20 : f32 to vector<8x8xf32>
      %42 = arith.addf %40, %41 : vector<8x8xf32>
      %43 = vector.shape_cast %42 : vector<8x8xf32> to vector<1x8x8xf32>
      %cst_21 = arith.constant dense<0.000000e+00> : vector<1xf32>
      %44 = vector.multi_reduction <add>, %43, %cst_21 [1, 2] : vector<1x8x8xf32> to vector<1xf32>
      %45 = vector.shape_cast %44 : vector<1xf32> to vector<1x1x1xf32>
      %46 = vector.extract %45[0, 0, 0] : f32 from vector<1x1x1xf32>
      %cst_22 = arith.constant 7.812500e-03 : f32
      %47 = arith.mulf %46, %cst_22 : f32
      %48 = vector.broadcast %47 : f32 to vector<1x8x128xf32>
      %c0_23 = arith.constant 0 : index
      %c0_24 = arith.constant 0 : index
      %c0_25 = arith.constant 0 : index
      %49 = vector.load %arg4[%c0_23, %c0_24, %c0_25] : memref<1x8x128xf32, #tpu.memory_space<vmem>>, vector<1x8x128xf32>
      tpu.vector_store %arg4[%c0_23, %c0_24, %c0_25], %48 {strides = array<i32>} : memref<1x8x128xf32, #tpu.memory_space<vmem>>, vector<1x8x128xf32>,
    } else {
    }
    return
  }
  func.func @transform_0(%arg0: i32, %arg1: i32) -> (i32, i32, i32) {
    %c0_i32 = arith.constant 0 : i32
    %c0_i32_0 = arith.constant 0 : i32
    %c0_i32_1 = arith.constant 0 : i32
    return %arg0, %c0_i32, %c0_i32_0 : i32, i32, i32
  }
  func.func @transform_1(%arg0: i32, %arg1: i32) -> (i32, i32) {
    %c0_i32 = arith.constant 0 : i32
    %c0_i32_0 = arith.constant 0 : i32
    return %arg1, %c0_i32 : i32, i32
  }
  func.func @transform_2(%arg0: i32, %arg1: i32) -> (i32, i32, i32) {
    %c0_i32 = arith.constant 0 : i32
    %c0_i32_0 = arith.constant 0 : i32
    %c0_i32_1 = arith.constant 0 : i32
    return %arg0, %c0_i32, %c0_i32_0 : i32, i32, i32
  }
}

</mosaic_0001>

<bundles_post_ra>
// kernel: tpu_custom_call.1
= control target key start
LH: loop header
LB: loop body
LE: loop exit
PB: predicated region body
PF: predicated region fallthrough
CT: control target
= control target key end

     0   :  { %7 = vsyncpa [#allocation5], 0  ;;  %s1285_s0 = inlined_call_operand.hbm [shape: f32[2,8,32], index: 0, kind: input, shape index: {}]   ;;  %s1286_s1 = inlined_call_operand.hbm [shape: f32[16,32], index: 1, kind: input, shape index: {}]   ;;  %s1287_s2 = inlined_call_operand.hbm [shape: f32[2,8,128], index: 2, kind: output, shape index: {}]  }
   0x1   :  { %9 = vsyncpa [#allocation5 + $0x1], 0 }
   0x2   :  { %10 = vsyncpa [#allocation8], 0 }
   0x3   :  { %11 = vsyncpa [#allocation6], 0 }
   0x4   :  { %13 = vsyncpa [#allocation6 + $0x1], 0  ;;  %s1050_s9 = smov 0   ;;  %s1052_s10 = smov 0  }
   0x5   :  { %s1054_s11 = smov 0   ;;  %s1056_s12 = smov 0  }
   0x6   :  { %s1058_s13 = smov 0   ;;  %s1060_s14 = smov 0  }
   0x7 LB: > { %s753_s15 = sadd.s32 4294967295, %s1025_s14   ;;  %s754_s16 = sadd.s32 4294967294, %s1025_s14   ;;  %s1025_s14 = sphi %s1060_s14, %s19_s14   ;;  %s1021_s13 = sphi %s1058_s13, %s1307_s13   ;;  %s1017_s12 = sphi %s1056_s12, %s1306_s12   ;;  %s1013_s11 = sphi %s1054_s11, %s1305_s11   ;;  %s1009_s10 = sphi %s1052_s10, %s1304_s10   ;;  %s1005_s9 = sphi %s1050_s9, %s1303_s9  }
   0x8   : > { %p51_p0 = scmp.ne.s32.totalorder %s1009_s10, %s1005_s9  ;;  %p1084_p1 = scmp.eq.s32.totalorder %s753_s15, 0 }
   0x9   : > { %p1088_p2 = scmp.eq.s32.totalorder %s753_s15, 1  ;;  %p107_p3 = scmp.eq.s32.totalorder %s754_s16, 1 }
   0xa   : > { %p1094_p4 = por %p1084_p1, %p51_p0  ;;  %p755_p5 = scmp.ge.s32.totalorder %s1025_s14, 1 }
   0xb   : > { %p1099_p6 = por %p107_p3, %p51_p0  ;;  %p114_p7 = scmp.lt.s32.totalorder %s1025_s14, 3 }
   0xc   : > { %s1291_s19 = scalar_select %p1094_p4, 1, 0 }
   0xd   : > { %s1292_s20 = scalar_select %p1099_p6, 1, 0 }
   0xe   : > { %p1104_p8 = pnand %p755_p5, %p114_p7  ;;  %s1027_s22 = smov [#allocation7]  }
   0xf   : > { %s129_s23 = sshll.u32 %s1027_s22, 4  ;;  %s31_s25 = sadd.s32 1, %s1021_s13  ;;  %s130_s23 = int_to_ptr.vmem [resolvable:$true] %s129_s23 }
  0x10   : > { %p801_p9 = pneg %p1104_p8  ;;  %s898_s26 = scalar_lea.vmem %s130_s23, 256 }
  0x11   : > { %p899_p13 = scmp.ne.s32.totalorder %s130_s23, %s898_s26  ;;  %p906_p5 = scmp.lt.s32.totalorder %s130_s23, %s130_s23 }
  0x12   : > { %p1113_p11 = pnand %p801_p9, %p1084_p1  ;;  %p907_p7 = scmp.lt.s32.totalorder %s898_s26, %s898_s26 }
  0x14   : > { %p889_p12 = pneg %p1113_p11  ;;  %p908_p6 = por %p907_p7, %p906_p5 }
  0x16   : > { %p901_p0 = pnand %p899_p13, %p889_p12 }
  0x18   : > { %p902_p3 = pneg %p901_p0 }
  0x1a   : > { %p909_p4 = pnand %p908_p6, %p902_p3 }
  0x1c   : > { %912 = shalt.err (!%p909_p4)
}
  0x1d   : > { %s1028_s27 = smov 128   ;;  %s1029_s28 = smov 8  }
  0x1e   : > { %804 = dma.hbm_to_vmem [thread:$0]  (!%p1113_p11), %s1286_s1, 256, %s130_s23, [#allocation8], %s1028_s27, %s1028_s27, %s1029_s28  }
  0x1f   : > { %p33_p6 = scmp.ge.s32.totalorder %s31_s25, 2  ;;  %s38_s3 = sadd.s32 1, %s1013_s11 }
  0x20   : > { %p45_p4 = scmp.ne.s32.totalorder %s1013_s11, %s1009_s10  ;;  %p46_p9 = scmp.eq.s32.totalorder %s1025_s14, 0 }
  0x21   : > { %s1309_s25 = smov (%p33_p6, %s31_s25), 0  ;;  %p814_p0 = scmp.lt.s32.totalorder %s1025_s14, 2 }
  0x22   : > { %p1131_p12 = por %p46_p9, %p45_p4  ;;  %p1137_p13 = por %p1088_p2, %p45_p4 }
  0x23   : > { %s35_s6 = ssub.s32 %s1021_s13, %s1309_s25  ;;  %s143_s7 = sand.u32 1, %s1013_s11  }
  0x24   : > { %p36_p11 = scmp.eq.s32.totalorder %s35_s6, 0  ;;  %s758_s8 = sshll.u32 %s143_s7, 3 }
  0x25   : > { %s759_s16 = sshll.u32 %s1021_s13, 7  ;;  %s147_s26 = scalar_lea.vmem [#allocation4], %s758_s8 }
  0x26   : > { %s1146_s15 = scalar_select %p36_p11, %s1013_s11, %s38_s3  }
  0x27   : > { %s152_s24 = scalar_lea.hbm %s1285_s0, %s759_s16  ;;  %s154_s27 = sshll.u32 %s147_s26, 4  ;;  %s155_s27 = int_to_ptr.vmem [resolvable:$true] %s154_s27 }
  0x28   : > { %p1154_p2 = pnand %p814_p0, %p1131_p12  ;;  %s144_s28 = scalar_lea.sflag [#allocation5], %s143_s7 }
  0x29   : > { %s926_s29 = scalar_lea.vmem %s155_s27, 128  ;;  %s1030_s30 = smov [#allocation4]  }
  0x2a   : > { %p915_p3 = pneg %p1154_p2  ;;  %p927_p5 = scmp.ne.s32.totalorder %s155_s27, %s926_s29 }
  0x2b   : > { %s931_s3 = sshll.u32 %s1030_s30, 4  ;;  %s932_s3 = int_to_ptr.vmem [resolvable:$false] %s931_s3 }
  0x2c   : > { %p929_p7 = pnand %p927_p5, %p915_p3  ;;  %s933_s6 = scalar_lea.vmem %s932_s3, 256 }
  0x2d   : > { %p934_p4 = scmp.lt.s32.totalorder %s155_s27, %s932_s3  ;;  %p935_p9 = scmp.lt.s32.totalorder %s933_s6, %s926_s29 }
  0x2e   : > { %p930_p6 = pneg %p929_p7 }
  0x2f   : > { %p936_p11 = por %p935_p9, %p934_p4 }
  0x31   : > { %p937_p10 = pnand %p936_p11, %p930_p6 }
  0x33   : > { %940 = shalt.err (!%p937_p10)
}
  0x34   : > { %808 = dma.hbm_to_vmem [thread:$0]  (!%p1154_p2), %s152_s24, 128, %s155_s27, %s144_s28  }
  0x35   : > { %163 = sbr.rel (%p1104_p8) target bundleno = 794 (0x31a), region = 28  ;;  %s1165_s4 = sand.u32 (!%p1104_p8), 1, %s1009_s10  }
  0x36   : > { %s761_s7 = sshll.u32 (!%p1104_p8), %s1165_s4, 3  ;;  %s166_s8 = scalar_lea.sflag (!%p1104_p8), [#allocation5], %s1165_s4 }
  0x37   : > { %s169_s16 = scalar_lea.vmem (!%p1104_p8), [#allocation4], %s761_s7  ;;  %p1298_p12 = scmp.ne.s32.totalorder (!%p1104_p8), %s1291_s19, 0 }
  0x3a   : > { %992 = dma.done.wait (%p1298_p12), %s166_s8, 128  }
  0x3b   : > { %994 = vsyncadd (%p1298_p12), %s166_s8, 4294967168 }
  0x3c   : > { %996 = dma.done.wait (%p1084_p1), [#allocation8], 256  }
  0x3d   : > { %998 = vsyncadd (%p1084_p1), [#allocation8], 4294967040  ;;  %v1031_v0 = vmov 0.0   ;;  %vm1032_vm0 = vmmov 0   ;;  %vm200_vm1 = vcmask 261120   ;;  %v195_v1 = vld [vmem:[%s169_s16] sm:$0xff]  ;;  %v366_v6 = vlaneseq }
  0x3e   : > { %779 = vmatprep.subr.mxu0 %v1031_v0  ;;  %781 = vmatprep.mubr.msk.f32.mxu0 %vm1032_vm0, %v1031_v0  ;;  %v279_v2 = vld [vmem:[#allocation7 + $0x8] sm:$0xff]  ;;  %v278_v3 = vld [vmem:[#allocation7] sm:$0xff]  ;;  %vm275_vm2 = vcmask 64512   ;;  %v1033_v4 = vmov 1966171168   ;;  %s769_s17 = sshll.u32 %s1017_s12, 3 }
  0x3f   : > { %784 = vmatprep.subr.mxu1 %v1031_v0  ;;  %788 = vmatprep.mubr.msk.f32.mxu1 %vm1032_vm0, %v1031_v0  ;;  %277 = vst.msk [vmem:[#allocation3] sm:$0xff] %vm275_vm2, %v1031_v0  ;;  %v364_v5 = vunpack.c.l.s4 %v1033_v4  ;;  %v1181_v10 = vshrl.u32 %v366_v6, 7  ;;  %s532_s19 = sadd.s32 8, %s769_s17  ;;  %vm547_vm6 = vcmask 130048   ;;  %vm612_vm7 = vcmask 1041409   ;;  %s193_s21 = scalar_lea.vmem [#allocation9], %s761_s7 }
  0x40   : > { %780 = vmatpush3.xpose.msk.msra.mxu0 %vm200_vm1, %v195_v1  ;;  %785 = vmatpush3.xpose.msk.msra.mxu1 %vm200_vm1, %v279_v2  ;;  %v533_v4 = vstv %s532_s19  ;;  %vm614_vm8 = vcmask 1042434   ;;  %vm616_vm9 = vcmask 1043459   ;;  %vm618_vm10 = vcmask 1044484   ;;  %s663_s22 = sshll.u32 %s193_s21, 4  ;;  %s771_s23 = sshll.u32 %s1017_s12, 7  ;;  %s664_s22 = int_to_ptr.vmem [resolvable:$true] %s663_s22 }
  0x41   : > { %786 = vmatprep.subr.mxu1 %v1031_v0  ;;  %v365_v7 = vunpack.c.0.s8 %v364_v5  ;;  %v428_v16 = vsub.s32 2, %v1181_v10  ;;  %v1187_v17 = vsub.s32 0, %v1181_v10  ;;  %v435_v23 = vsub.s32 3, %v1181_v10  ;;  %s1243_s28 = scalar_lea.hbm %s1287_s2, %s771_s23  ;;  %s650_s29 = scalar_lea.sflag [#allocation6], %s1165_s4 }
  0x42   : > { %v421_v27 = vsub.s32 1, %v1181_v10  ;;  %v449_v28 = vsub.s32 5, %v1181_v10  ;;  %v442_v33 = vsub.s32 4, %v1181_v10  ;;  %v463_v49 = vsub.s32 7, %v1181_v10  ;;  %s941_s30 = scalar_lea.vmem %s664_s22, 128  ;;  %s1034_s3 = smov [#allocation9]  }
  0x43   : > { %782 = vmatmul.mubr.msk.f32.vlgmr.msra.gmra.mxu0 %vm200_vm1, %v195_v1  ;;  %v368_v12 = vsub.s32 %v365_v7, %v1181_v10  ;;  %v456_v50 = vsub.s32 6, %v1181_v10  ;;  %v525_v0 = vand.u32 127, %v366_v6  ;;  %vm620_vm11 = vcmask 1045509   ;;  %p942_p1 = scmp.ne.s32.totalorder %s664_s22, %s941_s30  ;;  %s945_s6 = sshll.u32 %s1034_s3, 4  ;;  %s946_s6 = int_to_ptr.vmem [resolvable:$false] %s945_s6 }
  0x44   : > { %787 = vmatpush3.xpose.msk.msra.mxu1 %vm200_vm1, %v278_v3  ;;  %v530_v3 = vstv %s769_s17  ;;  %vm622_vm12 = vcmask 1046534   ;;  %vm624_vm13 = vcmask 1047559   ;;  %s947_s12 = scalar_lea.vmem %s946_s6, 256  ;;  %p948_p0 = scmp.lt.s32.totalorder %s664_s22, %s946_s6 }
  0x45   : > { %vm531_vm3 = vcmp.ge.s32.totalorder %v525_v0, %v530_v3  ;;  %vm534_vm4 = vcmp.lt.s32.totalorder %v525_v0, %v533_v4  ;;  %p943_p8 = pnand %p942_p1, %p1137_p13  ;;  %p949_p2 = scmp.lt.s32.totalorder %s947_s12, %s941_s30 }
  0x46   : > { %vm1206_vm5 = vmand %vm531_vm3, %vm534_vm4 }
  0x47   : > { %789 = vmatmul.mubr.msk.f32.vlgmr.msra.gmra.mxu1 %vm200_vm1, %v195_v1  ;;  %p944_p10 = pneg %p943_p8  ;;  %p950_p3 = por %p949_p2, %p948_p0 }
  0x49   : > { %p951_p5 = pnand %p950_p3, %p944_p10 }
 0x103   : > { %v270_v8 = vpop.f32.mrf.mxu0 }
 0x104   : > { %v274_v9 = vmul.f32 10.0, %v270_v8 }
 0x105   : > { %v783_v11 = vpop.f32.mrf.mxu0 }
 0x106   : > { %276 = vst.msk [vmem:[#allocation2] sm:$0xff] %vm275_vm2, %v274_v9 }
 0x107   : > { %v356_v13 = vpop.f32.mrf.mxu1 }
 0x108   : > { %v360_v14 = vmul.f32 10.0, %v356_v13 }
 0x109   : > { %v790_v15 = vpop.f32.mrf.mxu1 }
 0x10a   : > { %v362_v18 = vcombine.high %v360_v14, %v360_v14  ;;  %v369_v19 = vrot.slane %v360_v14, %v368_v12 }
 0x10c   : > { %v377_v20 = vcombine.high %v369_v19, %v369_v19  ;;  %v385_v21 = vrot.slane %v369_v19, %v368_v12  ;;  %v376_v24 = vrot.slane %v362_v18, %v368_v12 }
 0x10d   : > { %v411_v22 = vld [vmem:[#allocation2] sm:$0xff] }
 0x10e   : > { %v429_v25 = vrot.slane %v411_v22, %v428_v16  ;;  %v415_v26 = vrot.slane %v411_v22, %v1187_v17  ;;  %v407_v29 = vcombine.high %v385_v21, %v385_v21  ;;  %v471_v30 = vrot.slane %v385_v21, %v1187_v17 }
 0x10f   : > { %v399_v31 = vrot.slane %v377_v20, %v368_v12  ;;  %v436_v32 = vrot.slane %v411_v22, %v435_v23  ;;  %v378_v34 = vcombine.high %v376_v24, %v376_v24  ;;  %v392_v35 = vrot.slane %v376_v24, %v368_v12 }
 0x110   : > { %431 = vbcast.lane.b32.xlu1 %v429_v25, 256  ;;  %417 = vbcast.lane.b32.xlu0 %v415_v26, 256  ;;  %v422_v36 = vrot.slane %v411_v22, %v421_v27  ;;  %v479_v37 = vrot.slane %v407_v29, %v1187_v17  ;;  %v450_v47 = vrot.slane %v411_v22, %v449_v28 }
 0x111   : > { %v409_v38 = vcombine.high %v399_v31, %v399_v31  ;;  %v475_v39 = vrot.slane %v399_v31, %v1187_v17  ;;  %v406_v40 = vrot.slane %v378_v34, %v368_v12  ;;  %v487_v41 = vrot.slane %v392_v35, %v1187_v17 }
 0x112   : > { %v408_v42 = vcombine.high %v392_v35, %v392_v35  ;;  %v443_v48 = vrot.slane %v411_v22, %v442_v33  ;;  %v464_v52 = vrot.slane %v411_v22, %v463_v49  ;;  %v457_v53 = vrot.slane %v411_v22, %v456_v50 }
 0x113   : > { %v483_v43 = vrot.slane %v409_v38, %v1187_v17  ;;  %v491_v44 = vrot.slane %v406_v40, %v1187_v17  ;;  %v410_v45 = vcombine.high %v406_v40, %v406_v40 }
 0x114   : > { %438 = vbcast.lane.b32.xlu1 %v436_v32, 256  ;;  %424 = vbcast.lane.b32.xlu0 %v422_v36, 256  ;;  %v495_v46 = vrot.slane %v408_v42, %v1187_v17  ;;  %v582_v36 = vsub.s32 %v525_v0, %v1181_v10 }
 0x115   : > { %v499_v51 = vrot.slane %v410_v45, %v1187_v17 }
 0x118   : > { %452 = vbcast.lane.b32.xlu1 %v450_v47, 256  ;;  %445 = vbcast.lane.b32.xlu0 %v443_v48, 256 }
 0x11c   : > { %466 = vbcast.lane.b32.xlu1 %v464_v52, 256  ;;  %459 = vbcast.lane.b32.xlu0 %v457_v53, 256 }
 0x182   : > { %v432_v54 = vpop.permute.xlu1 %431  ;;  %v418_v55 = vpop.permute.xlu0 %417 }
 0x183   : > { %v510_v56 = vsub.f32 %v479_v37, %v432_v54  ;;  %v508_v57 = vsub.f32 %v471_v30, %v418_v55  ;;  %v546_v55 = vld [vmem:[#allocation3] sm:$0xff] }
 0x185   : > { %871 = vtanh.f32 %v510_v56 }
 0x186   : > { %873 = vtanh.f32 %v508_v57  ;;  %v439_v58 = vpop.permute.xlu1 %438  ;;  %v425_v59 = vpop.permute.xlu0 %424 }
 0x187   : > { %v511_v60 = vsub.f32 %v483_v43, %v439_v58  ;;  %v509_v61 = vsub.f32 %v475_v39, %v425_v59 }
 0x189   : > { %875 = vtanh.f32 %v511_v60 }
 0x18a   : > { %877 = vtanh.f32 %v509_v61  ;;  %v453_v62 = vpop.permute.xlu1 %452  ;;  %v446_v63 = vpop.permute.xlu0 %445 }
 0x18b   : > { %v513_v1 = vsub.f32 %v491_v44, %v453_v62  ;;  %v512_v2 = vsub.f32 %v487_v41, %v446_v63 }
 0x18d   : > { %879 = vtanh.f32 %v513_v1 }
 0x18e   : > { %881 = vtanh.f32 %v512_v2  ;;  %v467_v5 = vpop.permute.xlu1 %466  ;;  %v460_v7 = vpop.permute.xlu0 %459 }
 0x18f   : > { %v515_v8 = vsub.f32 %v499_v51, %v467_v5  ;;  %v514_v9 = vsub.f32 %v495_v46, %v460_v7 }
 0x191   : > { %883 = vtanh.f32 %v515_v8 }
 0x192   : > { %v872_v12 = vpop.eup %871  ;;  %885 = vtanh.f32 %v514_v9 }
 0x193   : > { %v874_v6 = vpop.eup %873  ;;  %v540_v16 = vsel %vm1206_vm5, 0.0, %v872_v12 }
 0x194   : > { %v538_v13 = vsel %vm1206_vm5, 0.0, %v874_v6  ;;  %v554_v19 = vsel %vm547_vm6, %v540_v16, 0.0 }
 0x195   : > { %v548_v14 = vsel %vm547_vm6, %v538_v13, 0.0 }
 0x196   : > { %v876_v15 = vpop.eup %875  ;;  %549 = vadd.xlane.f32.xlu0 %v548_v14 }
 0x197   : > { %v878_v17 = vpop.eup %877  ;;  %v541_v22 = vsel %vm1206_vm5, 0.0, %v876_v15 }
 0x198   : > { %v539_v18 = vsel %vm1206_vm5, 0.0, %v878_v17  ;;  %v557_v25 = vsel %vm547_vm6, %v541_v22, 0.0 }
 0x199   : > { %v551_v20 = vsel %vm547_vm6, %v539_v18, 0.0 }
 0x19a   : > { %v880_v21 = vpop.eup %879  ;;  %555 = vadd.xlane.f32.xlu0 %v554_v19  ;;  %552 = vadd.xlane.f32.xlu1 %v551_v20 }
 0x19b   : > { %v882_v23 = vpop.eup %881  ;;  %v543_v28 = vsel %vm1206_vm5, 0.0, %v880_v21 }
 0x19c   : > { %v542_v24 = vsel %vm1206_vm5, 0.0, %v882_v23  ;;  %v563_v31 = vsel %vm547_vm6, %v543_v28, 0.0 }
 0x19d   : > { %v560_v26 = vsel %vm547_vm6, %v542_v24, 0.0 }
 0x19e   : > { %v884_v27 = vpop.eup %883  ;;  %558 = vadd.xlane.f32.xlu0 %v557_v25  ;;  %561 = vadd.xlane.f32.xlu1 %v560_v26 }
 0x19f   : > { %v886_v29 = vpop.eup %885  ;;  %v545_v33 = vsel %vm1206_vm5, 0.0, %v884_v27 }
 0x1a0   : > { %v544_v30 = vsel %vm1206_vm5, 0.0, %v886_v29  ;;  %v569_v34 = vsel %vm547_vm6, %v545_v33, 0.0 }
 0x1a1   : > { %v566_v32 = vsel %vm547_vm6, %v544_v30, 0.0 }
 0x1a2   : > { %564 = vadd.xlane.f32.xlu0 %v563_v31  ;;  %567 = vadd.xlane.f32.xlu1 %v566_v32 }
 0x1a6   : > { %570 = vadd.xlane.f32.xlu0 %v569_v34 }
 0x21f   : > { %v550_v35 = vpop.xlane.xlu0 %549 }
 0x220   : > { %v583_v39 = vrot.slane %v550_v35, %v582_v36 }
 0x223   : > { %v553_v37 = vpop.xlane.xlu1 %552  ;;  %v556_v38 = vpop.xlane.xlu0 %555 }
 0x224   : > { %v587_v40 = vrot.slane %v553_v37, %v582_v36  ;;  %v591_v41 = vrot.slane %v556_v38, %v582_v36 }
 0x226   : > { %v613_v42 = vsel %vm612_vm7, %v587_v40, %v583_v39 }
 0x227   : > { %v562_v43 = vpop.xlane.xlu1 %561  ;;  %v559_v44 = vpop.xlane.xlu0 %558  ;;  %v615_v46 = vsel %vm614_vm8, %v591_v41, %v613_v42 }
 0x228   : > { %v595_v45 = vrot.slane %v559_v44, %v582_v36  ;;  %v599_v47 = vrot.slane %v562_v43, %v582_v36 }
 0x22a   : > { %v617_v48 = vsel %vm616_vm9, %v595_v45, %v615_v46 }
 0x22b   : > { %v568_v49 = vpop.xlane.xlu1 %567  ;;  %v565_v50 = vpop.xlane.xlu0 %564  ;;  %v619_v52 = vsel %vm618_vm10, %v599_v47, %v617_v48 }
 0x22c   : > { %v603_v10 = vrot.slane %v565_v50, %v582_v36  ;;  %v607_v51 = vrot.slane %v568_v49, %v582_v36 }
 0x22e   : > { %v621_v53 = vsel %vm620_vm11, %v603_v10, %v619_v52 }
 0x22f   : > { %v571_v54 = vpop.xlane.xlu0 %570  ;;  %v623_v57 = vsel %vm622_vm12, %v607_v51, %v621_v53 }
 0x230   : > { %v611_v56 = vrot.slane %v571_v54, %v582_v36 }
 0x232   : > { %v625_v58 = vsel %vm624_vm13, %v611_v56, %v623_v57 }
 0x233   : > { %v627_v59 = vadd.f32 %v625_v58, %v546_v55 }
 0x235   : > { %629 = vst.msk [vmem:[#allocation3] sm:$0xff] %vm275_vm2, %v627_v59 }
 0x23c   : > { %v633_v60 = vld [vmem:[#allocation3] sm:$0xff] }
 0x23d   : > { %v634_v61 = vmul.f32 0.5, %v633_v60 }
 0x23f   : > { %v635_v62 = vadd.f32 4.0, %v634_v61 }
 0x241   : > { %v636_v63 = vsel %vm275_vm2, %v635_v62, 0.0 }
 0x242   : > { %637 = vadd.xlane.f32.xlu1 %v636_v63 }
 0x2cb   : > { %v638_v0 = vpop.xlane.xlu1 %637 }
 0x2cc   : > { %v639_v1 = vrot.slane %v638_v0, 4 }
 0x2ce   : > { %v640_v2 = vadd.f32 %v639_v1, %v638_v0 }
 0x2d0   : > { %v641_v3 = vrot.slane %v640_v2, 2 }
 0x2d2   : > { %v642_v4 = vadd.f32 %v641_v3, %v640_v2 }
 0x2d4   : > { %v643_v5 = vrot.slane %v642_v4, 1 }
 0x2d6   : > { %v644_v7 = vadd.f32 %v643_v5, %v642_v4 }
 0x2d8   : > { %791 = vpush %v644_v7 }
 0x309   : > { %s792_s24 = spop %791 }
 0x30a   : > { %s646_s26 = smul.f32 0.0078125, %s792_s24 }
 0x30c   : > { %v647_v8 = vstv %s646_s26 }
 0x30d   : > { %648 = vst [vmem:[%s193_s21] sm:$0xff] %v647_v8 }
 0x30e   : > { %954 = shalt.err (!%p951_p5)
}
 0x30f   : > { %s955_s7 = scalar_lea.hbm %s1243_s28, 128  ;;  %s959_s16 = scalar_lea.hbm %s1287_s2, 256 }
 0x310   : > { %p956_p7 = scmp.ne.s32.totalorder %s1243_s28, %s955_s7  ;;  %p960_p9 = scmp.lt.s32.totalorder %s1243_s28, %s1287_s2 }
 0x311   : > { %p961_p11 = scmp.lt.s32.totalorder %s959_s16, %s955_s7 }
 0x312   : > { %p957_p6 = pnand %p956_p7, %p1137_p13 }
 0x313   : > { %p962_p12 = por %p961_p11, %p960_p9 }
 0x314   : > { %p958_p4 = pneg %p957_p6 }
 0x316   : > { %p963_p1 = pnand %p962_p12, %p958_p4 }
 0x318   : > { %966 = shalt.err (!%p963_p1)
}
 0x319   : > { %799 = dma.vmem_to_hbm [thread:$0]  (%p1137_p13), %s664_s22, 128, %s1243_s28, %s650_s29  }
 0x31a PF: > { %s675_s21 = sand.u32 1, %s1005_s9   ;;  %p1301_p8 = scmp.ne.s32.totalorder %s1292_s20, 0 }
 0x31b   : > { %p1302_p10 = scmp.ge.s32.totalorder %s1025_s14, 2  ;;  %s676_s23 = scalar_lea.sflag [#allocation6], %s675_s21 }
 0x31d   : > { %p810_p0 = pnand %p1302_p10, %p1301_p8 }
 0x31f   : > { %p811_p2 = pneg %p810_p0 }
 0x321   : > { %1000 = dma.done.wait (%p811_p2), %s676_s23, 128  }
 0x322   : > { %1002 = vsyncadd (%p811_p2), %s676_s23, 4294967168  ;;  %s19_s14 = sadd.s32 1, %s1025_s14   ;;  %s1303_s9 = smov %s1009_s10 }
 0x323   : > { %p16_p3 = scmp.ge.s32.totalorder %s19_s14, 4   ;;  %s1304_s10 = smov %s1013_s11 }
 0x324   : > { %s1305_s11 = smov %s1146_s15  ;;  %s1306_s12 = smov %s1021_s13 }
 0x325   : > { %s1307_s13 = smov %s1309_s25  ;;  %18 = sbr.rel (!%p16_p3) target bundleno = 7 (0x7), region = 86 }
 0x32a   :  { %681 = vsyncpa [#allocation5], 1 }
 0x32b   :  { %683 = vsyncpa [#allocation5 + $0x1], 1 }
 0x32c   :  { %684 = vsyncpa [#allocation8], 1 }
 0x32d   :  { %685 = vsyncpa [#allocation6], 1 }
 0x32e   :  { %687 = vsyncpa [#allocation6 + $0x1], 1 }

</bundles_post_ra>
